<compile_context>
chip_gen: v5e
topology: v5e:2x2
jax: 0.10.0
libtpu: 0.0.40
codegen_flags: <defaults>
</compile_context>

<pallas_src>
import jax
import jax.numpy as jnp
from jax.experimental import pallas as pl
from jax.experimental.pallas import tpu as pltpu

LANE = 128
SUBLANE = 8


def _cdiv(a, b):
    return -(-a // b)


def _round_up(x, m):
    return _cdiv(x, m) * m


def _pad2d(a, rows, cols):
    if a.shape == (rows, cols):
        return a
    return jnp.pad(a, ((0, rows - a.shape[0]), (0, cols - a.shape[1])))


def _choose_batch_tile(batch, block_b, min_programs=2):
    """Sublane-aligned batch tile minimizing padding, with >=min_programs grid
    steps when the batch allows it (so v7x's two TensorCores both get work)."""
    block_b = max(SUBLANE, _round_up(block_b, SUBLANE))
    n_tiles = max(_cdiv(batch, block_b), min_programs)
    tb = _round_up(_cdiv(batch, n_tiles), SUBLANE)
    return min(tb, block_b)


def _mlp_head_kernel(x_ref, w1_ref, b1_ref, w2_ref, b2_ref, wo_ref, bo_ref,
                     out_ref):
    """Fused (Linear+ReLU) x2 -> Linear -> sigmoid on one (TB, H0p) batch tile.

    x_ref : (TB, H0p) bf16 CLS-token features (batch tile, pipelined)
    w*    : bf16 (in_p, out_p) weights, VMEM-resident (single-buffered)
    b*    : f32  (1, out_p) biases
    out   : (TB, Cp) bf16 sigmoid probabilities (lane-dense store)
    """
    x = x_ref[...]                                            # bf16

    h1 = jnp.dot(x, w1_ref[...], preferred_element_type=jnp.float32)
    h1 = jnp.maximum(h1 + b1_ref[...], 0.0)                   # f32 epilogue

    h2 = jnp.dot(h1.astype(w2_ref.dtype), w2_ref[...],
                 preferred_element_type=jnp.float32)
    h2 = jnp.maximum(h2 + b2_ref[...], 0.0)

    # nn.Dropout is identity at inference time.
    logits = jnp.dot(h2.astype(wo_ref.dtype), wo_ref[...],
                     preferred_element_type=jnp.float32) + bo_ref[...]

    out_ref[...] = jax.nn.sigmoid(logits).astype(out_ref.dtype)


def text_classifier_head(cls_feats, kp, n_classes, *, block_b=256):
    """Run the fused Pallas classifier head on CLS features (B, H0)."""
    B, H0 = cls_feats.shape
    w1, b1 = kp["w1"], kp["b1"]
    w2, b2 = kp["w2"], kp["b2"]
    wo, bo = kp["wo"], kp["bo"]
    H0p, H1p = w1.shape
    H2p = w2.shape[1]
    Cp = wo.shape[1]
    assert H0 <= H0p and n_classes <= Cp

    # Batch tiling: sublane-aligned, minimal padding, >=2 programs when B allows.
    TB = _choose_batch_tile(B, block_b)
    B_pad = _round_up(B, TB)
    grid = (B_pad // TB,)

    # Pad CLS features to the padded feature width / batch tile, cast to bf16.
    # Cast first so the pad (if any) happens on bf16; skipped when aligned.
    x = _pad2d(cls_feats.astype(jnp.bfloat16), B_pad, H0p)

    flops = 2 * B_pad * (H0p * H1p + H1p * H2p + H2p * Cp)
    bytes_accessed = (x.size * 2
                      + (w1.size + w2.size + wo.size) * 2
                      + (b1.size + b2.size + bo.size) * 4
                      + B_pad * Cp * 2)                       # bf16 output
    cost = pl.CostEstimate(flops=flops,
                           transcendentals=B_pad * Cp,
                           bytes_accessed=bytes_accessed)

    # VMEM footprint: double-buffered x/out tiles, single-buffered weights,
    # f32 intermediates the compiler keeps live.  Raise the scoped limit on
    # v5e (16 MiB default) but never above 64 MiB (v7x physical).
    vmem_need = (2 * TB * H0p * 2
                 + (w1.size + w2.size + wo.size) * 2
                 + (b1.size + b2.size + bo.size) * 4
                 + 2 * TB * Cp * 2
                 + TB * (H1p + H2p + Cp) * 4)
    vmem_limit = int(min(max(2 * vmem_need + (2 << 20), 32 << 20), 64 << 20))

    weight_mode = pl.Buffered(1)   # constant block index -> 1 buffer is enough
    out = pl.pallas_call(
        _mlp_head_kernel,
        out_shape=jax.ShapeDtypeStruct((B_pad, Cp), jnp.bfloat16),
        grid=grid,
        in_specs=[
            # batch tile: pipelined (default double buffer)
            pl.BlockSpec((TB, H0p), lambda i: (i, 0)),
            # weights/biases: constant block index, single-buffered, VMEM-resident
            pl.BlockSpec((H0p, H1p), lambda i: (0, 0), pipeline_mode=weight_mode),
            pl.BlockSpec((1, H1p), lambda i: (0, 0), pipeline_mode=weight_mode),
            pl.BlockSpec((H1p, H2p), lambda i: (0, 0), pipeline_mode=weight_mode),
            pl.BlockSpec((1, H2p), lambda i: (0, 0), pipeline_mode=weight_mode),
            pl.BlockSpec((H2p, Cp), lambda i: (0, 0), pipeline_mode=weight_mode),
            pl.BlockSpec((1, Cp), lambda i: (0, 0), pipeline_mode=weight_mode),
        ],
        out_specs=pl.BlockSpec((TB, Cp), lambda i: (i, 0)),
        compiler_params=pltpu.CompilerParams(
            dimension_semantics=("parallel",),        # shard batch across TCs
            vmem_limit_bytes=vmem_limit),
        cost_estimate=cost,
    )(x, w1, b1, w2, b2, wo, bo)

    # Slice off batch/class padding; upcast probabilities to f32 for consumers.
    return out[:B, :n_classes].astype(jnp.float32)


def text_classifier_forward(input_ids, attention_mask, emb_table, kparams,
                            n_classes):
    """Full forward: CLS-row embedding stand-in (glue) + Pallas head kernel."""
    del attention_mask  # TODO(synk): attention_mask only affects the real
                        # transformer encoder, which is not reproduced here.
    # Gather ONLY the CLS-token embedding rows -> (B, H0); no (B, S, H0)
    # hidden_state is materialized.
    # TODO(synk): for real encoder widths (H0 >= 768) fuse this gather into the
    # kernel via PrefetchScalarGridSpec + manual per-row DMA from pl.ANY.
    cls_feats = jnp.take(emb_table, input_ids[:, 0], axis=0)
    return text_classifier_head(cls_feats, kparams, n_classes)


def init_params(key, h0, hidden_sizes, n_classes):
    """Deterministic Linear weights, (in, out) layout, plus (1, out) biases."""
    dims = [h0] + hidden_sizes + [n_classes]
    keys = jax.random.split(key, 2 * (len(dims) - 1))
    names = ["1", "2", "o"]
    params = {}
    for i, (din, dout) in enumerate(zip(dims[:-1], dims[1:])):
        scale = 1.0 / jnp.sqrt(jnp.float32(din))
        params[f"w{names[i]}"] = (
            jax.random.uniform(keys[2 * i], (din, dout), jnp.float32,
                               minval=-1.0, maxval=1.0) * scale)
        params[f"b{names[i]}"] = (
            jax.random.uniform(keys[2 * i + 1], (1, dout), jnp.float32,
                               minval=-1.0, maxval=1.0) * scale)
    return params


def prepare_params(params):
    """Kernel layout: bf16 weights, f32 biases, all dims zero-padded to 128."""
    # TODO(synk): on v7x, fp8 weight storage (scale folded into the f32
    # epilogue) would halve weight VMEM/HBM again for real encoder widths.
    kp = {}
    for name in ("1", "2", "o"):
        w = params[f"w{name}"]
        b = params[f"b{name}"]
        kp[f"w{name}"] = _pad2d(w.astype(jnp.bfloat16),
                                _round_up(w.shape[0], LANE),
                                _round_up(w.shape[1], LANE))
        kp[f"b{name}"] = _pad2d(b.astype(jnp.float32), 1,
                                _round_up(b.shape[1], LANE))
    return kp


if __name__ == "__main__":
    # Small, module-consistent shapes.
    B = 2              # batch
    S = 8              # max_length (sequence length)
    H0 = 32            # embedding_model.config.hidden_size
    HIDDEN = [32, 16]  # hidden_size list
    C = 4              # n_classes
    VOCAB = 64

    key = jax.random.PRNGKey(0)
    k_ids, k_emb, k_params = jax.random.split(key, 3)

    input_ids = jax.random.randint(k_ids, (B, S), 0, VOCAB, dtype=jnp.int32)
    attention_mask = jnp.ones((B, S), dtype=jnp.int32)
    emb_table = jax.random.normal(k_emb, (VOCAB, H0), dtype=jnp.float32)
    params = init_params(k_params, H0, HIDDEN, C)
    kparams = prepare_params(params)

    out = text_classifier_forward(input_ids, attention_mask, emb_table,
                                  kparams, C)
    out = jax.block_until_ready(out)

    # Pure-JAX reference mirroring the kernel's dtype plan
    # (bf16 matmul inputs, f32 accumulation, f32 bias + sigmoid epilogue,
    #  bf16 output rounding).
    def bf16(a):
        return a.astype(jnp.bfloat16)

    cls = emb_table[input_ids[:, 0]]
    h1 = jnp.maximum(
        jnp.dot(bf16(cls), bf16(params["w1"]),
                preferred_element_type=jnp.float32) + params["b1"], 0.0)
    h2 = jnp.maximum(
        jnp.dot(bf16(h1), bf16(params["w2"]),
                preferred_element_type=jnp.float32) + params["b2"], 0.0)
    ref = jax.nn.sigmoid(
        jnp.dot(bf16(h2), bf16(params["wo"]),
                preferred_element_type=jnp.float32) + params["bo"])
    ref = ref.astype(jnp.bfloat16).astype(jnp.float32)

    assert out.shape == (B, C)
    assert out.dtype == jnp.float32
    assert jnp.allclose(out, ref, atol=1e-2, rtol=2e-2)

    print("KERNEL_OK")
</pallas_src>

<mosaic_0001>
module attributes {stable_mosaic.version = 11 : i64} {
  func.func @_mlp_head_kernel(%arg0: i32, %arg1: memref<8x128xbf16, #tpu.memory_space<vmem>>, %arg2: memref<128x128xbf16, #tpu.memory_space<vmem>>, %arg3: memref<1x128xf32, #tpu.memory_space<vmem>>, %arg4: memref<128x128xbf16, #tpu.memory_space<vmem>>, %arg5: memref<1x128xf32, #tpu.memory_space<vmem>>, %arg6: memref<128x128xbf16, #tpu.memory_space<vmem>>, %arg7: memref<1x128xf32, #tpu.memory_space<vmem>>, %arg8: memref<8x128xbf16, #tpu.memory_space<vmem>>) attributes {dimension_semantics = [#tpu.dimension_semantics<parallel>], iteration_bounds = array<i64: 1>, scalar_prefetch = 0 : i64, scratch_operands = 0 : i64, tpu.core_type = #tpu.core_type<tc>, window_params = [{transform_indices = @transform_0, window_bounds = array<i64: 8, 128>}, {pipeline_mode = #tpu.pipeline_mode<synchronous>, transform_indices = @transform_1, window_bounds = array<i64: 128, 128>}, {pipeline_mode = #tpu.pipeline_mode<synchronous>, transform_indices = @transform_2, window_bounds = array<i64: 1, 128>}, {pipeline_mode = #tpu.pipeline_mode<synchronous>, transform_indices = @transform_3, window_bounds = array<i64: 128, 128>}, {pipeline_mode = #tpu.pipeline_mode<synchronous>, transform_indices = @transform_4, window_bounds = array<i64: 1, 128>}, {pipeline_mode = #tpu.pipeline_mode<synchronous>, transform_indices = @transform_5, window_bounds = array<i64: 128, 128>}, {pipeline_mode = #tpu.pipeline_mode<synchronous>, transform_indices = @transform_6, window_bounds = array<i64: 1, 128>}, {transform_indices = @transform_7, window_bounds = array<i64: 8, 128>}]} {
    %c0 = arith.constant 0 : index
    %c0_0 = arith.constant 0 : index
    %0 = vector.load %arg1[%c0, %c0_0] : memref<8x128xbf16, #tpu.memory_space<vmem>>, vector<8x128xbf16>
    %c0_1 = arith.constant 0 : index
    %c0_2 = arith.constant 0 : index
    %1 = vector.load %arg2[%c0_1, %c0_2] : memref<128x128xbf16, #tpu.memory_space<vmem>>, vector<128x128xbf16>
    %cst = arith.constant dense<0.000000e+00> : vector<8x128xf32>
    %2 = tpu.matmul %0, %1, %cst {dimension_numbers = #tpu.dot_dimension_numbers<[1], [0], [0], [1], [0, 0, 1, 1], [], []>} : vector<8x128xbf16>, vector<128x128xbf16>, vector<8x128xf32> -> vector<8x128xf32>
    %c0_3 = arith.constant 0 : index
    %c0_4 = arith.constant 0 : index
    %3 = vector.load %arg3[%c0_3, %c0_4] : memref<1x128xf32, #tpu.memory_space<vmem>>, vector<1x128xf32>
    %4 = vector.broadcast %3 : vector<1x128xf32> to vector<8x128xf32>
    %5 = arith.addf %2, %4 : vector<8x128xf32>
    %cst_5 = arith.constant 0.000000e+00 : f32
    %6 = vector.broadcast %cst_5 : f32 to vector<8x128xf32>
    %7 = arith.maximumf %5, %6 : vector<8x128xf32>
    %8 = arith.truncf %7 : vector<8x128xf32> to vector<8x128xbf16>
    %c0_6 = arith.constant 0 : index
    %c0_7 = arith.constant 0 : index
    %9 = vector.load %arg4[%c0_6, %c0_7] : memref<128x128xbf16, #tpu.memory_space<vmem>>, vector<128x128xbf16>
    %cst_8 = arith.constant dense<0.000000e+00> : vector<8x128xf32>
    %10 = tpu.matmul %8, %9, %cst_8 {dimension_numbers = #tpu.dot_dimension_numbers<[1], [0], [0], [1], [0, 0, 1, 1], [], []>} : vector<8x128xbf16>, vector<128x128xbf16>, vector<8x128xf32> -> vector<8x128xf32>
    %c0_9 = arith.constant 0 : index
    %c0_10 = arith.constant 0 : index
    %11 = vector.load %arg5[%c0_9, %c0_10] : memref<1x128xf32, #tpu.memory_space<vmem>>, vector<1x128xf32>
    %12 = vector.broadcast %11 : vector<1x128xf32> to vector<8x128xf32>
    %13 = arith.addf %10, %12 : vector<8x128xf32>
    %cst_11 = arith.constant 0.000000e+00 : f32
    %14 = vector.broadcast %cst_11 : f32 to vector<8x128xf32>
    %15 = arith.maximumf %13, %14 : vector<8x128xf32>
    %16 = arith.truncf %15 : vector<8x128xf32> to vector<8x128xbf16>
    %c0_12 = arith.constant 0 : index
    %c0_13 = arith.constant 0 : index
    %17 = vector.load %arg6[%c0_12, %c0_13] : memref<128x128xbf16, #tpu.memory_space<vmem>>, vector<128x128xbf16>
    %cst_14 = arith.constant dense<0.000000e+00> : vector<8x128xf32>
    %18 = tpu.matmul %16, %17, %cst_14 {dimension_numbers = #tpu.dot_dimension_numbers<[1], [0], [0], [1], [0, 0, 1, 1], [], []>} : vector<8x128xbf16>, vector<128x128xbf16>, vector<8x128xf32> -> vector<8x128xf32>
    %c0_15 = arith.constant 0 : index
    %c0_16 = arith.constant 0 : index
    %19 = vector.load %arg7[%c0_15, %c0_16] : memref<1x128xf32, #tpu.memory_space<vmem>>, vector<1x128xf32>
    %20 = vector.broadcast %19 : vector<1x128xf32> to vector<8x128xf32>
    %21 = arith.addf %18, %20 : vector<8x128xf32>
    %22 = arith.negf %21 : vector<8x128xf32>
    %23 = math.exp %22 : vector<8x128xf32>
    %cst_17 = arith.constant 1.000000e+00 : f32
    %24 = vector.broadcast %cst_17 : f32 to vector<8x128xf32>
    %25 = arith.addf %24, %23 : vector<8x128xf32>
    %26 = arith.divf %24, %25 : vector<8x128xf32>
    %27 = arith.truncf %26 : vector<8x128xf32> to vector<8x128xbf16>
    %c0_18 = arith.constant 0 : index
    %c0_19 = arith.constant 0 : index
    %28 = vector.load %arg8[%c0_18, %c0_19] : memref<8x128xbf16, #tpu.memory_space<vmem>>, vector<8x128xbf16>
    tpu.vector_store %arg8[%c0_18, %c0_19], %27 {strides = array<i32>} : memref<8x128xbf16, #tpu.memory_space<vmem>>, vector<8x128xbf16>,
    return
  }
  func.func @transform_0(%arg0: i32) -> (i32, i32) {
    %c0_i32 = arith.constant 0 : i32
    %c0_i32_0 = arith.constant 0 : i32
    return %arg0, %c0_i32 : i32, i32
  }
  func.func @transform_1(%arg0: i32) -> (i32, i32) {
    %c0_i32 = arith.constant 0 : i32
    %c0_i32_0 = arith.constant 0 : i32
    %c0_i32_1 = arith.constant 0 : i32
    return %c0_i32, %c0_i32_0 : i32, i32
  }
  func.func @transform_2(%arg0: i32) -> (i32, i32) {
    %c0_i32 = arith.constant 0 : i32
    %c0_i32_0 = arith.constant 0 : i32
    %c0_i32_1 = arith.constant 0 : i32
    return %c0_i32, %c0_i32_0 : i32, i32
  }
  func.func @transform_3(%arg0: i32) -> (i32, i32) {
    %c0_i32 = arith.constant 0 : i32
    %c0_i32_0 = arith.constant 0 : i32
    %c0_i32_1 = arith.constant 0 : i32
    return %c0_i32, %c0_i32_0 : i32, i32
  }
  func.func @transform_4(%arg0: i32) -> (i32, i32) {
    %c0_i32 = arith.constant 0 : i32
    %c0_i32_0 = arith.constant 0 : i32
    %c0_i32_1 = arith.constant 0 : i32
    return %c0_i32, %c0_i32_0 : i32, i32
  }
  func.func @transform_5(%arg0: i32) -> (i32, i32) {
    %c0_i32 = arith.constant 0 : i32
    %c0_i32_0 = arith.constant 0 : i32
    %c0_i32_1 = arith.constant 0 : i32
    return %c0_i32, %c0_i32_0 : i32, i32
  }
  func.func @transform_6(%arg0: i32) -> (i32, i32) {
    %c0_i32 = arith.constant 0 : i32
    %c0_i32_0 = arith.constant 0 : i32
    %c0_i32_1 = arith.constant 0 : i32
    return %c0_i32, %c0_i32_0 : i32, i32
  }
  func.func @transform_7(%arg0: i32) -> (i32, i32) {
    %c0_i32 = arith.constant 0 : i32
    %c0_i32_0 = arith.constant 0 : i32
    return %arg0, %c0_i32 : i32, i32
  }
}

</mosaic_0001>

<bundles_post_ra>
// kernel: tpu_custom_call.1
= control target key start
LH: loop header
LB: loop body
LE: loop exit
PB: predicated region body
PF: predicated region fallthrough
CT: control target
= control target key end

     0   :  { %12 = vsyncpa [#allocation3], 0  ;;  %s710_s0 = inlined_call_operand.hbm [shape: bf16[8,128], index: 0, kind: input, shape index: {}]   ;;  %s711_s1 = inlined_call_operand.hbm [shape: bf16[128,128], index: 1, kind: input, shape index: {}]   ;;  %s712_s2 = inlined_call_operand.vmem [shape: f32[1,128], index: 2, kind: input, shape index: {}]   ;;  %s713_s3 = inlined_call_operand.hbm [shape: bf16[128,128], index: 3, kind: input, shape index: {}]   ;;  %s714_s4 = inlined_call_operand.vmem [shape: f32[1,128], index: 4, kind: input, shape index: {}]   ;;  %s715_s5 = inlined_call_operand.hbm [shape: bf16[128,128], index: 5, kind: input, shape index: {}]   ;;  %s716_s6 = inlined_call_operand.vmem [shape: f32[1,128], index: 6, kind: input, shape index: {}]   ;;  %s717_s7 = inlined_call_operand.hbm [shape: bf16[8,128], index: 7, kind: output, shape index: {}]  }
   0x1   :  { %13 = vsyncpa [#allocation6], 0 }
   0x2   :  { %14 = vsyncpa [#allocation9], 0  ;;  %s31_s26 = sshll.u32 %s711_s1, 4  ;;  %s32_s26 = int_to_ptr.hbm [resolvable:$true] %s31_s26 }
   0x3   :  { %15 = vsyncpa [#allocation4], 0  ;;  %s639_s27 = smov [#allocation5]   ;;  %s21_s8 = sshll.u32 %s710_s0, 4  ;;  %s22_s8 = int_to_ptr.hbm [resolvable:$true] %s21_s8 }
   0x4   :  { %s33_s28 = sshll.u32 %s639_s27, 4  ;;  %s640_s9 = smov 64   ;;  %s34_s28 = int_to_ptr.vmem [resolvable:$true] %s33_s28 }
   0x5   :  { %s641_s10 = smov 4   ;;  %s642_s11 = smov [#allocation2]  }
   0x6   :  { %39 = dma.hbm_to_vmem [thread:$0]  %s32_s26, 1024, %s34_s28, [#allocation6], %s640_s9, %s640_s9, %s641_s10  }
   0x7   :  { %s23_s12 = sshll.u32 %s642_s11, 4  ;;  %s46_s15 = sshll.u32 %s713_s3, 4  ;;  %s24_s12 = int_to_ptr.vmem [resolvable:$true] %s23_s12  ;;  %s47_s15 = int_to_ptr.hbm [resolvable:$true] %s46_s15 }
   0x8   :  { %26 = dma.hbm_to_vmem [thread:$0]  %s22_s8, 64, %s24_s12, [#allocation3]  }
   0x9   :  { %s61_s17 = sshll.u32 %s715_s5, 4  ;;  %s643_s18 = smov [#allocation7]   ;;  %s62_s17 = int_to_ptr.hbm [resolvable:$true] %s61_s17 }
   0xa   :  { %s48_s19 = sshll.u32 %s643_s18, 4  ;;  %s644_s0 = smov [#allocation8]   ;;  %s49_s19 = int_to_ptr.vmem [resolvable:$true] %s48_s19 }
   0xb   :  { %54 = dma.hbm_to_vmem [thread:$0]  %s47_s15, 1024, %s49_s19, [#allocation6], %s640_s9, %s640_s9, %s641_s10  }
   0xc   :  { %s63_s20 = sshll.u32 %s644_s0, 4  ;;  %s64_s20 = int_to_ptr.vmem [resolvable:$true] %s63_s20 }
   0xd   :  { %69 = dma.hbm_to_vmem [thread:$0]  %s62_s17, 1024, %s64_s20, [#allocation9], %s640_s9, %s640_s9, %s641_s10  }
   0xe   :  { %631 = dma.done.wait [#allocation3], 64  }
   0xf   :  { %632 = vsyncadd [#allocation3], 4294967232 }
  0x10   :  { %633 = dma.done.wait [#allocation6], 2048  }
  0x11   :  { %634 = vsyncadd [#allocation6], 4294965248 }
  0x12   :  { %635 = dma.done.wait [#allocation9], 1024  }
  0x13   :  { %636 = vsyncadd [#allocation9], 4294966272  ;;  %v480_v0 = vld [vmem:[#allocation5 + $0x38] sm:$0xff]  ;;  %v479_v1 = vld [vmem:[#allocation5 + $0x30] sm:$0xff]  ;;  %s364_s26 = sshll.u32 %s717_s7, 4  ;;  %s365_s26 = int_to_ptr.hbm [resolvable:$true] %s364_s26 }
  0x14   :  { %157 = vmatpush.bf16.msra.mxu0 %v480_v0  ;;  %v488_v2 = vld [vmem:[#allocation7 + $0x38] sm:$0xff]  ;;  %v487_v3 = vld [vmem:[#allocation7 + $0x30] sm:$0xff]  ;;  %v478_v4 = vld [vmem:[#allocation5 + $0x28] sm:$0xff] }
  0x15   :  { %240 = vmatpush.bf16.msra.mxu1 %v488_v2  ;;  %v486_v5 = vld [vmem:[#allocation7 + $0x28] sm:$0xff]  ;;  %v477_v6 = vld [vmem:[#allocation5 + $0x20] sm:$0xff]  ;;  %v476_v8 = vld [vmem:[#allocation5 + $0x18] sm:$0xff] }
  0x16   :  { %v485_v7 = vld [vmem:[#allocation7 + $0x20] sm:$0xff]  ;;  %v484_v9 = vld [vmem:[#allocation7 + $0x18] sm:$0xff]  ;;  %v475_v10 = vld [vmem:[#allocation5 + $0x10] sm:$0xff] }
  0x17   :  { %v483_v11 = vld [vmem:[#allocation7 + $0x10] sm:$0xff]  ;;  %v474_v12 = vld [vmem:[#allocation5 + $0x8] sm:$0xff]  ;;  %v473_v13 = vld [vmem:[#allocation5] sm:$0xff] }
  0x18   :  { %158 = vmatpush.bf16.msra.mxu0 %v479_v1  ;;  %v88_v14 = vld [vmem:[#allocation2] sm:$0xf]  ;;  %v482_v15 = vld [vmem:[#allocation7 + $0x8] sm:$0xff]  ;;  %v481_v16 = vld [vmem:[#allocation7] sm:$0xff] }
  0x19   :  { %241 = vmatpush.bf16.msra.mxu1 %v487_v3  ;;  %v496_v17 = vld [vmem:[#allocation8 + $0x38] sm:$0xff]  ;;  %v495_v18 = vld [vmem:[#allocation8 + $0x30] sm:$0xff]  ;;  %v494_v19 = vld [vmem:[#allocation8 + $0x28] sm:$0xff] }
  0x1a   :  { %323 = vmatpush.bf16.msra.mxu2 %v496_v17  ;;  %v493_v20 = vld [vmem:[#allocation8 + $0x20] sm:$0xff]  ;;  %v492_v21 = vld [vmem:[#allocation8 + $0x18] sm:$0xff]  ;;  %v491_v22 = vld [vmem:[#allocation8 + $0x10] sm:$0xff] }
  0x1b   :  { %v504_v23 = vld [vmem:[%s712_s2] ss:$0 sm:$0xff]  ;;  %v490_v29 = vld [vmem:[#allocation8 + $0x8] sm:$0xff]  ;;  %v489_v30 = vld [vmem:[#allocation8] sm:$0xff] }
  0x1c   :  { %159 = vmatpush.bf16.msra.mxu0 %v478_v4  ;;  %v505_v31 = vld [vmem:[%s714_s4] ss:$0 sm:$0xff]  ;;  %s645_s4 = smov [#allocation10]  }
  0x1d   :  { %242 = vmatpush.bf16.msra.mxu1 %v486_v5  ;;  %v506_v37 = vld [vmem:[%s716_s6] ss:$0 sm:$0xff]  ;;  %s362_s6 = sshll.u32 %s645_s4, 4  ;;  %s363_s6 = int_to_ptr.vmem [resolvable:$true] %s362_s6 }
  0x1e   :  { %324 = vmatpush.bf16.msra.mxu2 %v495_v18 }
  0x20   :  { %160 = vmatpush.bf16.msra.mxu0 %v477_v6 }
  0x21   :  { %243 = vmatpush.bf16.msra.mxu1 %v485_v7 }
  0x22   :  { %325 = vmatpush.bf16.msra.mxu2 %v494_v19 }
  0x24   :  { %161 = vmatpush.bf16.msra.mxu0 %v476_v8 }
  0x25   :  { %244 = vmatpush.bf16.msra.mxu1 %v484_v9 }
  0x26   :  { %326 = vmatpush.bf16.msra.mxu2 %v493_v20 }
  0x28   :  { %162 = vmatpush.bf16.msra.mxu0 %v475_v10 }
  0x29   :  { %245 = vmatpush.bf16.msra.mxu1 %v483_v11 }
  0x2a   :  { %327 = vmatpush.bf16.msra.mxu2 %v492_v21 }
  0x2c   :  { %163 = vmatpush.bf16.msra.mxu0 %v474_v12 }
  0x2d   :  { %246 = vmatpush.bf16.msra.mxu1 %v482_v15 }
  0x2e   :  { %328 = vmatpush.bf16.msra.mxu2 %v491_v22 }
  0x30   :  { %164 = vmatpush.bf16.msra.mxu0 %v473_v13 }
  0x31   :  { %247 = vmatpush.bf16.msra.mxu1 %v481_v16 }
  0x32   :  { %329 = vmatpush.bf16.msra.mxu2 %v490_v29 }
  0x33   :  { %165 = vmatmul.bf16.vlgmr.msra.gmra.mxu0 %v88_v14 }
  0x36   :  { %330 = vmatpush.bf16.msra.mxu2 %v489_v30 }
  0xb0   :  { %v166_v24 = vpop.f32.mrf.mxu0 }
  0xb1   :  { %v167_v25 = vadd.f32 %v504_v23, %v166_v24 }
  0xb3   :  { %v170_v26 = vmax.f32 %v167_v25, 0.0 }
  0xb5   :  { %v171_v27 = vpack.c.bf16 %v170_v26, %v170_v26 }
  0xb7   :  { %248 = vmatmul.bf16.vlgmr.msra.gmra.mxu1 %v171_v27 }
  0xb8   :  { %v168_v28 = vpop.f32.mrf.mxu0 }
 0x134   :  { %v249_v32 = vpop.f32.mrf.mxu1 }
 0x135   :  { %v250_v33 = vadd.f32 %v505_v31, %v249_v32 }
 0x137   :  { %v253_v34 = vmax.f32 %v250_v33, 0.0 }
 0x139   :  { %v254_v35 = vpack.c.bf16 %v253_v34, %v253_v34 }
 0x13b   :  { %331 = vmatmul.bf16.vlgmr.msra.gmra.mxu2 %v254_v35 }
 0x13c   :  { %v251_v36 = vpop.f32.mrf.mxu1 }
 0x1be   :  { %v332_v38 = vpop.f32.mrf.mxu2 }
 0x1bf   :  { %v333_v39 = vadd.f32 %v506_v37, %v332_v38 }
 0x1c1   :  { %v472_v40 = vmul.f32 -1.442695, %v333_v39 }
 0x1c3   :  { %507 = vpow2.f32 %v472_v40 }
 0x1c6   :  { %v334_v41 = vpop.f32.mrf.mxu2 }
 0x1c9   :  { %v508_v42 = vpop.eup %507 }
 0x1ca   :  { %v339_v43 = vadd.f32 1.0, %v508_v42 }
 0x1cc   :  { %509 = vrcp.f32 %v339_v43  ;;  %v351_v47 = vand.u32 2147483648, %v339_v43  ;;  %v349_v49 = vand.u32 2147483647, %v339_v43  ;;  %vm345_vm1 = vweird.f32 %v339_v43 }
 0x1ce   :  { %v352_v51 = vor.u32 1.1754944e-38, %v351_v47  ;;  %vm350_vm3 = vcmp.eq.f32.partialorder %v349_v49, 8.507059e+37 }
 0x1d2   :  { %v510_v44 = vpop.eup %509 }
 0x1d3   :  { %v341_v45 = vmul.f32 %v510_v44, %v339_v43  ;;  %vm346_vm0 = vweird.f32 %v510_v44 }
 0x1d4   :  { %vm347_vm2 = vmor %vm345_vm1, %vm346_vm0 }
 0x1d5   :  { %v342_v46 = vsub.f32 1.0, %v341_v45 }
 0x1d7   :  { %v343_v48 = vmul.f32 %v510_v44, %v342_v46 }
 0x1d9   :  { %v344_v50 = vadd.f32 %v510_v44, %v343_v48 }
 0x1db   :  { %v348_v52 = vsel %vm347_vm2, %v510_v44, %v344_v50 }
 0x1dc   :  { %v353_v53 = vsel %vm350_vm3, %v352_v51, %v348_v52 }
 0x1dd   :  { %v355_v54 = vpack.c.bf16 %v353_v53, %v353_v53 }
 0x1df   :  { %356 = vst [vmem:[#allocation10] sm:$0xf] %v355_v54 }
 0x1e0   :  { %367 = dma.vmem_to_hbm [thread:$0]  %s363_s6, 64, %s365_s26, [#allocation4]  }
 0x1e1   :  { %637 = dma.done.wait [#allocation4], 64  }
 0x1e2   :  { %638 = vsyncadd [#allocation4], 4294967232 }
 0x1e3   :  { %372 = vsyncpa [#allocation3], 1 }
 0x1e4   :  { %373 = vsyncpa [#allocation6], 1 }
 0x1e5   :  { %374 = vsyncpa [#allocation9], 1 }
 0x1e6   :  { %375 = vsyncpa [#allocation4], 1 }

</bundles_post_ra>
